<compile_context>
chip_gen: v5e
topology: v5e:2x2
jax: 0.10.0
libtpu: 0.0.40
codegen_flags: <defaults>
</compile_context>

<pallas_src>
import jax
import jax.numpy as jnp
import numpy as np
from jax.experimental import pallas as pl
from jax.experimental.pallas import tpu as pltpu

# ---------------- model dimensions (small, consistent with an image classifier) ----
N, C, H, W = 2, 4, 16, 16           # batch, channels, spatial
IN_DIM = C * H * W                  # 1024 (already lane-aligned)
HIDDEN = 32                         # encoder output dim (feature dim z)
NUM_CLASSES = 8

_SUBLANE = 8                        # f32 sublane count of a vreg


def _round_up(x, m):
    return ((x + m - 1) // m) * m


# ---------------------------- Pallas kernel ---------------------------------------
def image_classifier_kernel(scale_ref, x_ref, w_enc_ref, b_enc_ref,
                            w_clf_ref, b_clf_ref, out_ref):
    # image encoder: z = ReLU(x @ W_enc + b_enc)
    # bf16 MXU inputs, f32 accumulation, f32 epilogue.
    z = jnp.dot(x_ref[...], w_enc_ref[...], preferred_element_type=jnp.float32)
    z = jnp.maximum(z + b_enc_ref[...], 0.0)

    # classification head: logits = z @ W_clf + b_clf  (z re-cast to bf16 for MXU)
    logits = jnp.dot(z.astype(w_clf_ref.dtype), w_clf_ref[...],
                     preferred_element_type=jnp.float32)
    logits = logits + b_clf_ref[...]

    # exp(logit_scale) * logits.  logit_scale is a scalar read once from a 1-D
    # SMEM ref; splat it to a (1,1) vreg before exp so the transcendental runs
    # on the vector (EUP) path, then broadcast-multiply on the VPU.
    scale_vec = jnp.exp(jnp.full((1, 1), scale_ref[0], dtype=jnp.float32))
    out_ref[...] = scale_vec * logits


# ------------------------- one-time parameter packing ------------------------------
def prepare_params(w_enc, b_enc, w_clf, b_clf, logit_scale):
    """Hoisted out of the per-call path: cast/reshape parameters once.

    Weights go to bf16 (native MXU input dtype), biases stay f32 row-vectors,
    logit_scale becomes a 1-element f32 vector destined for SMEM.
    """
    return {
        "w_enc": w_enc.astype(jnp.bfloat16),                       # (IN_DIM, HIDDEN)
        "b_enc": b_enc.reshape(1, -1).astype(jnp.float32),         # (1, HIDDEN)
        "w_clf": w_clf.astype(jnp.bfloat16),                       # (HIDDEN, NUM_CLASSES)
        "b_clf": b_clf.reshape(1, -1).astype(jnp.float32),         # (1, NUM_CLASSES)
        "scale": jnp.reshape(logit_scale, (1,)).astype(jnp.float32),
    }


# ------------------------------ per-call wrapper ------------------------------------
@jax.jit
def image_classifier(x_nchw, params):
    w_enc, b_enc = params["w_enc"], params["b_enc"]
    w_clf, b_clf = params["w_clf"], params["b_clf"]
    scale = params["scale"]

    n = x_nchw.shape[0]
    in_dim, hidden = w_enc.shape
    n_cls = w_clf.shape[1]
    n_pad = _round_up(n, _SUBLANE)          # sublane-dense batch rows

    # Per-call glue (plain JAX, fused under jit): flatten NCHW -> (N, K), cast
    # to bf16 for the MXU, and pad only the batch dim to a full sublane group.
    # Zero rows contribute exactly 0 through matmul/ReLU and are sliced off.
    x_flat = x_nchw.reshape(n, -1).astype(jnp.bfloat16)
    x_p = jnp.pad(x_flat, ((0, n_pad - n), (0, 0)))

    vmem = pl.BlockSpec(memory_space=pltpu.MemorySpace.VMEM)
    smem = pl.BlockSpec(memory_space=pltpu.MemorySpace.SMEM)

    # Advisory cost estimate on logical (unpadded) shapes / actual dtypes.
    flops = 2 * n * (in_dim * hidden + hidden * n_cls)
    bytes_accessed = (2 * (x_p.size + w_enc.size + w_clf.size)     # bf16 reads
                      + 4 * (b_enc.size + b_clf.size + 1)          # f32 bias + scalar
                      + 4 * n_pad * n_cls)                         # f32 output

    out_padded = pl.pallas_call(
        image_classifier_kernel,
        out_shape=jax.ShapeDtypeStruct((n_pad, n_cls), jnp.float32),
        in_specs=[smem, vmem, vmem, vmem, vmem, vmem],
        out_specs=vmem,
        cost_estimate=pl.CostEstimate(flops=flops, transcendentals=1,
                                      bytes_accessed=bytes_accessed),
    )(scale, x_p, w_enc, b_enc, w_clf, b_clf)

    return out_padded[:n, :]


# ------------------------------ driver ---------------------------------------------
if __name__ == "__main__":
    key = jax.random.PRNGKey(0)
    kx, k1, k2, k3, k4 = jax.random.split(key, 5)

    # deterministic parameter init (shapes implied by the module's forward)
    x = jax.random.normal(kx, (N, C, H, W), dtype=jnp.float32)
    w_enc = (jax.random.normal(k1, (IN_DIM, HIDDEN), dtype=jnp.float32)
             / np.sqrt(IN_DIM))
    b_enc = jax.random.normal(k2, (1, HIDDEN), dtype=jnp.float32) * 0.01
    w_clf = (jax.random.normal(k3, (HIDDEN, NUM_CLASSES), dtype=jnp.float32)
             / np.sqrt(HIDDEN))
    b_clf = jax.random.normal(k4, (1, NUM_CLASSES), dtype=jnp.float32) * 0.01
    logit_scale = jnp.array(np.log(1.0 / 0.07), dtype=jnp.float32)  # CLIP-style init

    params = prepare_params(w_enc, b_enc, w_clf, b_clf, logit_scale)

    out = jax.block_until_ready(image_classifier(x, params))

    # pure-JAX reference with the same numerics as the kernel
    # (bf16 MXU inputs, f32 accumulation, f32 epilogue)
    x_bf = x.reshape(N, -1).astype(jnp.bfloat16)
    z_ref = jnp.maximum(
        jnp.dot(x_bf, w_enc.astype(jnp.bfloat16),
                preferred_element_type=jnp.float32) + b_enc, 0.0)
    ref = jnp.exp(logit_scale) * (
        jnp.dot(z_ref.astype(jnp.bfloat16), w_clf.astype(jnp.bfloat16),
                preferred_element_type=jnp.float32) + b_clf)
    np.testing.assert_allclose(np.asarray(out), np.asarray(ref),
                               rtol=1e-2, atol=1e-2)

    print("KERNEL_OK")
</pallas_src>

<mosaic_0001>
module attributes {stable_mosaic.version = 11 : i64} {
  func.func @image_classifier_kernel(%arg0: memref<1xf32, #tpu.memory_space<smem>>, %arg1: memref<8x1024xbf16, #tpu.memory_space<vmem>>, %arg2: memref<1024x32xbf16, #tpu.memory_space<vmem>>, %arg3: memref<1x32xf32, #tpu.memory_space<vmem>>, %arg4: memref<32x8xbf16, #tpu.memory_space<vmem>>, %arg5: memref<1x8xf32, #tpu.memory_space<vmem>>, %arg6: memref<8x8xf32, #tpu.memory_space<vmem>>) attributes {dimension_semantics = [], scalar_prefetch = 0 : i64, scratch_operands = 0 : i64, tpu.core_type = #tpu.core_type<tc>} {
    %c0 = arith.constant 0 : index
    %c0_0 = arith.constant 0 : index
    %0 = vector.load %arg1[%c0, %c0_0] : memref<8x1024xbf16, #tpu.memory_space<vmem>>, vector<8x1024xbf16>
    %c0_1 = arith.constant 0 : index
    %c0_2 = arith.constant 0 : index
    %1 = vector.load %arg2[%c0_1, %c0_2] : memref<1024x32xbf16, #tpu.memory_space<vmem>>, vector<1024x32xbf16>
    %cst = arith.constant dense<0.000000e+00> : vector<8x32xf32>
    %2 = tpu.matmul %0, %1, %cst {dimension_numbers = #tpu.dot_dimension_numbers<[1], [0], [0], [1], [0, 0, 1, 1], [], []>} : vector<8x1024xbf16>, vector<1024x32xbf16>, vector<8x32xf32> -> vector<8x32xf32>
    %c0_3 = arith.constant 0 : index
    %c0_4 = arith.constant 0 : index
    %3 = vector.load %arg3[%c0_3, %c0_4] : memref<1x32xf32, #tpu.memory_space<vmem>>, vector<1x32xf32>
    %4 = vector.broadcast %3 : vector<1x32xf32> to vector<8x32xf32>
    %5 = arith.addf %2, %4 : vector<8x32xf32>
    %cst_5 = arith.constant 0.000000e+00 : f32
    %6 = vector.broadcast %cst_5 : f32 to vector<8x32xf32>
    %7 = arith.maximumf %5, %6 : vector<8x32xf32>
    %8 = arith.truncf %7 : vector<8x32xf32> to vector<8x32xbf16>
    %c0_6 = arith.constant 0 : index
    %c0_7 = arith.constant 0 : index
    %9 = vector.load %arg4[%c0_6, %c0_7] : memref<32x8xbf16, #tpu.memory_space<vmem>>, vector<32x8xbf16>
    %cst_8 = arith.constant dense<0.000000e+00> : vector<8x8xf32>
    %10 = tpu.matmul %8, %9, %cst_8 {dimension_numbers = #tpu.dot_dimension_numbers<[1], [0], [0], [1], [0, 0, 1, 1], [], []>} : vector<8x32xbf16>, vector<32x8xbf16>, vector<8x8xf32> -> vector<8x8xf32>
    %c0_9 = arith.constant 0 : index
    %c0_10 = arith.constant 0 : index
    %11 = vector.load %arg5[%c0_9, %c0_10] : memref<1x8xf32, #tpu.memory_space<vmem>>, vector<1x8xf32>
    %12 = vector.broadcast %11 : vector<1x8xf32> to vector<8x8xf32>
    %13 = arith.addf %10, %12 : vector<8x8xf32>
    %c0_11 = arith.constant 0 : index
    %14 = memref.load %arg0[%c0_11] : memref<1xf32, #tpu.memory_space<smem>>
    %15 = vector.broadcast %14 : f32 to vector<1x1xf32>
    %16 = math.exp %15 : vector<1x1xf32>
    %17 = vector.broadcast %16 : vector<1x1xf32> to vector<8x8xf32>
    %18 = arith.mulf %17, %13 : vector<8x8xf32>
    %c0_12 = arith.constant 0 : index
    %c0_13 = arith.constant 0 : index
    %19 = vector.load %arg6[%c0_12, %c0_13] : memref<8x8xf32, #tpu.memory_space<vmem>>, vector<8x8xf32>
    tpu.vector_store %arg6[%c0_12, %c0_13], %18 {strides = array<i32>} : memref<8x8xf32, #tpu.memory_space<vmem>>, vector<8x8xf32>,
    return
  }
}

</mosaic_0001>

<bundles_post_ra>
// kernel: image_classifier.1
= control target key start
LH: loop header
LB: loop body
LE: loop exit
PB: predicated region body
PF: predicated region fallthrough
CT: control target
= control target key end

     0   :  { %vm699_vm0 = vcmask 261120   ;;  %vm721_vm1 = vcmask 64512   ;;  %s1319_s2 = inlined_call_operand.vmem [shape: bf16[1024,32], index: 2, kind: input, shape index: {}]   ;;  %s1320_s3 = inlined_call_operand.vmem [shape: f32[1,32], index: 3, kind: input, shape index: {}]   ;;  %s1321_s1 = inlined_call_operand.vmem [shape: bf16[8,1024], index: 1, kind: input, shape index: {}]   ;;  %s1322_s5 = inlined_call_operand.vmem [shape: f32[1,8], index: 5, kind: input, shape index: {}]   ;;  %s1323_s4 = inlined_call_operand.vmem [shape: bf16[32,8], index: 4, kind: input, shape index: {}]   ;;  %s1324_s0 = inlined_call_operand.<no memory space> [shape: f32[1], index: 0, kind: input, shape index: {}]   ;;  %s1325_s6 = inlined_call_operand.vmem [shape: f32[8,8], index: 6, kind: output, shape index: {}]  }
   0x1   :  { %v999_v0 = vld [vmem:[%s1319_s2 + $0x38] sm:$0xff]  ;;  %v998_v4 = vld [vmem:[%s1319_s2 + $0x30] sm:$0xff]  ;;  %v997_v8 = vld [vmem:[%s1319_s2 + $0x28] sm:$0xff] }
   0x2   :  { %v1007_v1 = vld [vmem:[%s1319_s2 + $0x78] sm:$0xff]  ;;  %573 = vmatpush.bf16.msra.mxu0 %v999_v0  ;;  %v1006_v5 = vld [vmem:[%s1319_s2 + $0x70] sm:$0xff]  ;;  %v1005_v9 = vld [vmem:[%s1319_s2 + $0x68] sm:$0xff] }
   0x3   :  { %v1015_v2 = vld [vmem:[%s1319_s2 + $0xb8] sm:$0xff]  ;;  %586 = vmatpush.bf16.msra.mxu1 %v1007_v1  ;;  %v1014_v6 = vld [vmem:[%s1319_s2 + $0xb0] sm:$0xff]  ;;  %v1013_v10 = vld [vmem:[%s1319_s2 + $0xa8] sm:$0xff] }
   0x4   :  { %v1023_v3 = vld [vmem:[%s1319_s2 + $0xf8] sm:$0xff]  ;;  %599 = vmatpush.bf16.msra.mxu2 %v1015_v2  ;;  %v1022_v7 = vld [vmem:[%s1319_s2 + $0xf0] sm:$0xff]  ;;  %v1021_v11 = vld [vmem:[%s1319_s2 + $0xe8] sm:$0xff] }
   0x5   :  { %612 = vmatpush.bf16.msra.mxu3 %v1023_v3  ;;  %v996_v12 = vld [vmem:[%s1319_s2 + $0x20] sm:$0xff]  ;;  %v995_v16 = vld [vmem:[%s1319_s2 + $0x18] sm:$0xff]  ;;  %v994_v20 = vld [vmem:[%s1319_s2 + $0x10] sm:$0xff] }
   0x6   :  { %574 = vmatpush.bf16.msra.mxu0 %v998_v4  ;;  %v1004_v13 = vld [vmem:[%s1319_s2 + $0x60] sm:$0xff]  ;;  %v1003_v17 = vld [vmem:[%s1319_s2 + $0x58] sm:$0xff]  ;;  %v1002_v21 = vld [vmem:[%s1319_s2 + $0x50] sm:$0xff] }
   0x7   :  { %587 = vmatpush.bf16.msra.mxu1 %v1006_v5  ;;  %v1012_v14 = vld [vmem:[%s1319_s2 + $0xa0] sm:$0xff]  ;;  %v1011_v18 = vld [vmem:[%s1319_s2 + $0x98] sm:$0xff]  ;;  %v1010_v22 = vld [vmem:[%s1319_s2 + $0x90] sm:$0xff] }
   0x8   :  { %600 = vmatpush.bf16.msra.mxu2 %v1014_v6  ;;  %v1020_v15 = vld [vmem:[%s1319_s2 + $0xe0] sm:$0xff]  ;;  %v1019_v19 = vld [vmem:[%s1319_s2 + $0xd8] sm:$0xff]  ;;  %v1018_v23 = vld [vmem:[%s1319_s2 + $0xd0] sm:$0xff] }
   0x9   :  { %613 = vmatpush.bf16.msra.mxu3 %v1022_v7  ;;  %v993_v24 = vld [vmem:[%s1319_s2 + $0x8] sm:$0xff]  ;;  %v25_v29 = vld [vmem:[%s1321_s1] sm:$0xff]  ;;  %v1031_v38 = vld [vmem:[%s1319_s2 + $0x138] sm:$0xff] }
   0xa   :  { %575 = vmatpush.bf16.msra.mxu0 %v997_v8  ;;  %v1001_v25 = vld [vmem:[%s1319_s2 + $0x48] sm:$0xff]  ;;  %v992_v30 = vld [vmem:[%s1319_s2] sm:$0xff]  ;;  %v165_v33 = vunpack.c.l.b16 %v25_v29  ;;  %v166_v37 = vunpack.c.h.b16 %v25_v29  ;;  %v1039_v39 = vld [vmem:[%s1319_s2 + $0x178] sm:$0xff] }
   0xb   :  { %588 = vmatpush.bf16.msra.mxu1 %v1005_v9  ;;  %v1009_v26 = vld [vmem:[%s1319_s2 + $0x88] sm:$0xff]  ;;  %v1000_v31 = vld [vmem:[%s1319_s2 + $0x40] sm:$0xff]  ;;  %v1047_v40 = vld [vmem:[%s1319_s2 + $0x1b8] sm:$0xff] }
   0xc   :  { %601 = vmatpush.bf16.msra.mxu2 %v1013_v10  ;;  %v1017_v27 = vld [vmem:[%s1319_s2 + $0xc8] sm:$0xff]  ;;  %v1008_v34 = vld [vmem:[%s1319_s2 + $0x80] sm:$0xff]  ;;  %v1055_v41 = vld [vmem:[%s1319_s2 + $0x1f8] sm:$0xff]  ;;  %v173_v43 = vpack.c.b16 %v165_v33, %v165_v33  ;;  %v174_v45 = vpack.c.b16 %v166_v37, %v166_v37 }
   0xd   :  { %614 = vmatpush.bf16.msra.mxu3 %v1021_v11  ;;  %v26_v28 = vld [vmem:[%s1321_s1 + $0x8] sm:$0xff]  ;;  %v1016_v35 = vld [vmem:[%s1319_s2 + $0xc0] sm:$0xff]  ;;  %v1030_v46 = vld [vmem:[%s1319_s2 + $0x130] sm:$0xff] }
   0xe   :  { %576 = vmatpush.bf16.msra.mxu0 %v996_v12  ;;  %v167_v32 = vunpack.c.l.b16 %v26_v28  ;;  %v168_v36 = vunpack.c.h.b16 %v26_v28  ;;  %v1038_v47 = vld [vmem:[%s1319_s2 + $0x170] sm:$0xff]  ;;  %v1029_v50 = vld [vmem:[%s1319_s2 + $0x128] sm:$0xff]  ;;  %v1028_v54 = vld [vmem:[%s1319_s2 + $0x120] sm:$0xff] }
   0xf   :  { %589 = vmatpush.bf16.msra.mxu1 %v1004_v13  ;;  %v1046_v48 = vld [vmem:[%s1319_s2 + $0x1b0] sm:$0xff]  ;;  %v1037_v51 = vld [vmem:[%s1319_s2 + $0x168] sm:$0xff]  ;;  %v1036_v55 = vld [vmem:[%s1319_s2 + $0x160] sm:$0xff] }
  0x10   :  { %602 = vmatpush.bf16.msra.mxu2 %v1012_v14  ;;  %v175_v42 = vpack.c.b16 %v167_v32, %v167_v32  ;;  %v176_v44 = vpack.c.b16 %v168_v36, %v168_v36  ;;  %v1054_v49 = vld [vmem:[%s1319_s2 + $0x1f0] sm:$0xff]  ;;  %v1045_v52 = vld [vmem:[%s1319_s2 + $0x1a8] sm:$0xff]  ;;  %v1044_v56 = vld [vmem:[%s1319_s2 + $0x1a0] sm:$0xff] }
  0x11   :  { %615 = vmatpush.bf16.msra.mxu3 %v1020_v15  ;;  %v1053_v53 = vld [vmem:[%s1319_s2 + $0x1e8] sm:$0xff]  ;;  %v1052_v57 = vld [vmem:[%s1319_s2 + $0x1e0] sm:$0xff]  ;;  %v1027_v58 = vld [vmem:[%s1319_s2 + $0x118] sm:$0xff] }
  0x12   :  { %577 = vmatpush.bf16.msra.mxu0 %v995_v16  ;;  %v1035_v59 = vld [vmem:[%s1319_s2 + $0x158] sm:$0xff]  ;;  %v1026_v62 = vld [vmem:[%s1319_s2 + $0x110] sm:$0xff]  ;;  %v1025_v2 = vld [vmem:[%s1319_s2 + $0x108] sm:$0xff] }
  0x13   :  { %590 = vmatpush.bf16.msra.mxu1 %v1003_v17  ;;  %v1043_v60 = vld [vmem:[%s1319_s2 + $0x198] sm:$0xff]  ;;  %v1034_v63 = vld [vmem:[%s1319_s2 + $0x150] sm:$0xff]  ;;  %v1033_v3 = vld [vmem:[%s1319_s2 + $0x148] sm:$0xff] }
  0x14   :  { %603 = vmatpush.bf16.msra.mxu2 %v1011_v18  ;;  %v1051_v61 = vld [vmem:[%s1319_s2 + $0x1d8] sm:$0xff]  ;;  %v1042_v0 = vld [vmem:[%s1319_s2 + $0x190] sm:$0xff]  ;;  %v1041_v5 = vld [vmem:[%s1319_s2 + $0x188] sm:$0xff] }
  0x15   :  { %616 = vmatpush.bf16.msra.mxu3 %v1019_v19  ;;  %v1050_v1 = vld [vmem:[%s1319_s2 + $0x1d0] sm:$0xff]  ;;  %v1049_v6 = vld [vmem:[%s1319_s2 + $0x1c8] sm:$0xff]  ;;  %v28_v7 = vld [vmem:[%s1321_s1 + $0x18] sm:$0xff] }
  0x16   :  { %578 = vmatpush.bf16.msra.mxu0 %v994_v20  ;;  %v27_v4 = vld [vmem:[%s1321_s1 + $0x10] sm:$0xff]  ;;  %v1024_v10 = vld [vmem:[%s1319_s2 + $0x100] sm:$0xff]  ;;  %v171_v12 = vunpack.c.l.b16 %v28_v7  ;;  %v172_v13 = vunpack.c.h.b16 %v28_v7  ;;  %v1057_v20 = vld [vmem:[%s1323_s4 + $0x8] sm:$0xff] }
  0x17   :  { %591 = vmatpush.bf16.msra.mxu1 %v1002_v21  ;;  %v169_v8 = vunpack.c.l.b16 %v27_v4  ;;  %v170_v9 = vunpack.c.h.b16 %v27_v4  ;;  %v1032_v11 = vld [vmem:[%s1319_s2 + $0x140] sm:$0xff] }
  0x18   :  { %604 = vmatpush.bf16.msra.mxu2 %v1010_v22  ;;  %v1040_v14 = vld [vmem:[%s1319_s2 + $0x180] sm:$0xff]  ;;  %v179_v18 = vpack.c.b16 %v171_v12, %v171_v12  ;;  %v180_v19 = vpack.c.b16 %v172_v13, %v172_v13 }
  0x19   :  { %617 = vmatpush.bf16.msra.mxu3 %v1018_v23  ;;  %v1048_v15 = vld [vmem:[%s1319_s2 + $0x1c0] sm:$0xff]  ;;  %v177_v16 = vpack.c.b16 %v169_v8, %v169_v8  ;;  %v178_v17 = vpack.c.b16 %v170_v9, %v170_v9 }
  0x1a   :  { %579 = vmatpush.bf16.msra.mxu0 %v993_v24  ;;  %v1058_v28 = vld [vmem:[%s1320_s3] ss:$0 sm:$0xff] }
  0x1b   :  { %592 = vmatpush.bf16.msra.mxu1 %v1001_v25 }
  0x1c   :  { %605 = vmatpush.bf16.msra.mxu2 %v1009_v26  ;;  %v1056_v26 = vld [vmem:[%s1323_s4] sm:$0xff] }
  0x1d   :  { %618 = vmatpush.bf16.msra.mxu3 %v1017_v27 }
  0x1e   :  { %580 = vmatpush.bf16.msra.mxu0 %v992_v30 }
  0x1f   :  { %593 = vmatpush.bf16.msra.mxu1 %v1000_v31 }
  0x20   :  { %606 = vmatpush.bf16.msra.mxu2 %v1008_v34 }
  0x21   :  { %619 = vmatpush.bf16.msra.mxu3 %v1016_v35  ;;  %581 = vmatmul.bf16.vlgmr.msra.gmra.mxu0 %v173_v43 }
  0x22   :  { %625 = vmatpush.bf16.msrb.mxu0 %v1031_v38  ;;  %594 = vmatmul.bf16.vlgmr.msra.gmra.mxu1 %v174_v45 }
  0x23   :  { %638 = vmatpush.bf16.msrb.mxu1 %v1039_v39  ;;  %607 = vmatmul.bf16.vlgmr.msra.gmra.mxu2 %v175_v42 }
  0x24   :  { %651 = vmatpush.bf16.msrb.mxu2 %v1047_v40  ;;  %620 = vmatmul.bf16.vlgmr.msra.gmra.mxu3 %v176_v44 }
  0x25   :  { %664 = vmatpush.bf16.msrb.mxu3 %v1055_v41 }
  0x26   :  { %626 = vmatpush.bf16.msrb.mxu0 %v1030_v46 }
  0x27   :  { %639 = vmatpush.bf16.msrb.mxu1 %v1038_v47 }
  0x28   :  { %652 = vmatpush.bf16.msrb.mxu2 %v1046_v48 }
  0x29   :  { %665 = vmatpush.bf16.msrb.mxu3 %v1054_v49  ;;  %v717_v49 = vstv %s1324_s0 }
  0x2a   :  { %627 = vmatpush.bf16.msrb.mxu0 %v1029_v50  ;;  %v718_v50 = vmul.f32 1.442695, %v717_v49 }
  0x2b   :  { %640 = vmatpush.bf16.msrb.mxu1 %v1037_v51  ;;  %v1059_v51 = vld [vmem:[%s1322_s5] ss:$0 sm:$0xff] }
  0x2c   :  { %653 = vmatpush.bf16.msrb.mxu2 %v1045_v52  ;;  %1060 = vpow2.f32 %v718_v50 }
  0x2d   :  { %666 = vmatpush.bf16.msrb.mxu3 %v1053_v53 }
  0x2e   :  { %628 = vmatpush.bf16.msrb.mxu0 %v1028_v54 }
  0x2f   :  { %641 = vmatpush.bf16.msrb.mxu1 %v1036_v55 }
  0x30   :  { %654 = vmatpush.bf16.msrb.mxu2 %v1044_v56 }
  0x31   :  { %667 = vmatpush.bf16.msrb.mxu3 %v1052_v57 }
  0x32   :  { %629 = vmatpush.bf16.msrb.mxu0 %v1027_v58  ;;  %v1061_v52 = vpop.eup %1060 }
  0x33   :  { %642 = vmatpush.bf16.msrb.mxu1 %v1035_v59 }
  0x34   :  { %655 = vmatpush.bf16.msrb.mxu2 %v1043_v60 }
  0x35   :  { %668 = vmatpush.bf16.msrb.mxu3 %v1051_v61 }
  0x36   :  { %630 = vmatpush.bf16.msrb.mxu0 %v1026_v62 }
  0x37   :  { %643 = vmatpush.bf16.msrb.mxu1 %v1034_v63 }
  0x38   :  { %656 = vmatpush.bf16.msrb.mxu2 %v1042_v0 }
  0x39   :  { %669 = vmatpush.bf16.msrb.mxu3 %v1050_v1 }
  0x3a   :  { %631 = vmatpush.bf16.msrb.mxu0 %v1025_v2 }
  0x3b   :  { %644 = vmatpush.bf16.msrb.mxu1 %v1033_v3 }
  0x3c   :  { %657 = vmatpush.bf16.msrb.mxu2 %v1041_v5 }
  0x3d   :  { %670 = vmatpush.bf16.msrb.mxu3 %v1049_v6 }
  0x3e   :  { %632 = vmatpush.bf16.msrb.mxu0 %v1024_v10 }
  0x3f   :  { %645 = vmatpush.bf16.msrb.mxu1 %v1032_v11 }
  0x40   :  { %658 = vmatpush.bf16.msrb.mxu2 %v1040_v14 }
  0x41   :  { %671 = vmatpush.bf16.msrb.mxu3 %v1048_v15  ;;  %633 = vmatmul.bf16.vlgmr.msrb.gmra.mxu0 %v177_v16 }
  0x42   :  { %646 = vmatmul.bf16.vlgmr.msrb.gmra.mxu1 %v178_v17  ;;  %709 = vmatpush.bf16.msra.mxu0 %v1057_v20 }
  0x43   :  { %659 = vmatmul.bf16.vlgmr.msrb.gmra.mxu2 %v179_v18 }
  0x44   :  { %672 = vmatmul.bf16.vlgmr.msrb.gmra.mxu3 %v180_v19 }
  0x46   :  { %710 = vmatpush.bf16.msra.mxu0 %v1056_v26 }
  0x9e   :  { %v582_v21 = vpop.f32.mrf.mxu0 }
  0x9f   :  { %v595_v22 = vpop.f32.mrf.mxu1  ;;  %v583_v31 = vadd.f32 %v1058_v28, %v582_v21 }
  0xa1   :  { %v596_v32 = vadd.f32 %v595_v22, %v583_v31 }
  0xa6   :  { %v608_v23 = vpop.f32.mrf.mxu2  ;;  %v584_v25 = vpop.f32.mrf.mxu0 }
  0xa7   :  { %v621_v24 = vpop.f32.mrf.mxu3  ;;  %v597_v27 = vpop.f32.mrf.mxu1  ;;  %v609_v33 = vadd.f32 %v608_v23, %v596_v32 }
  0xa9   :  { %v622_v34 = vadd.f32 %v621_v24, %v609_v33 }
  0xae   :  { %v610_v29 = vpop.f32.mrf.mxu2 }
  0xaf   :  { %v623_v30 = vpop.f32.mrf.mxu3 }
  0xbe   :  { %v634_v35 = vpop.f32.mrf.mxu0 }
  0xbf   :  { %v647_v36 = vpop.f32.mrf.mxu1  ;;  %v635_v37 = vadd.f32 %v634_v35, %v622_v34 }
  0xc1   :  { %v648_v38 = vadd.f32 %v647_v36, %v635_v37 }
  0xc6   :  { %v660_v39 = vpop.f32.mrf.mxu2  ;;  %v636_v42 = vpop.f32.mrf.mxu0 }
  0xc7   :  { %v673_v40 = vpop.f32.mrf.mxu3  ;;  %v661_v41 = vadd.f32 %v660_v39, %v648_v38  ;;  %v649_v43 = vpop.f32.mrf.mxu1 }
  0xc9   :  { %v674_v44 = vadd.f32 %v673_v40, %v661_v41 }
  0xcb   :  { %v677_v45 = vmax.f32 %v674_v44, 0.0 }
  0xcd   :  { %v678_v46 = vpack.c.bf16 %v677_v45, %v677_v45 }
  0xce   :  { %v662_v47 = vpop.f32.mrf.mxu2 }
  0xcf   :  { %v675_v48 = vpop.f32.mrf.mxu3  ;;  %991 = vmatmul.msk.bf16.vlgmr.msra.gmra.mxu0 %vm699_vm0, %v678_v46 }
 0x14c   :  { %v712_v53 = vpop.f32.mrf.mxu0 }
 0x14d   :  { %v713_v54 = vadd.f32 %v1059_v51, %v712_v53 }
 0x14f   :  { %v720_v55 = vmul.f32 %v1061_v52, %v713_v54 }
 0x151   :  { %722 = vst.msk [vmem:[%s1325_s6] sm:$0xff] %vm721_vm1, %v720_v55 }
 0x154   :  { %v714_v56 = vpop.f32.mrf.mxu0 }

</bundles_post_ra>
